<compile_context>
chip_gen: v7x
topology: tpu7x:2x2x1
jax: 0.10.0
libtpu: 0.0.40
codegen_flags: <defaults>
</compile_context>

<pallas_src>
import jax
import jax.numpy as jnp
from jax import lax
from jax.experimental import pallas as pl
from jax.experimental.pallas import tpu as pltpu


def _cdiv(a: int, b: int) -> int:
    return -(-a // b)


def _round_up(a: int, b: int) -> int:
    return _cdiv(a, b) * b


def _vmem_budget_and_limit():
    """Per-TensorCore tile budget and scoped-VMEM limit to request.

    v5e/v6e: 128 MiB physical (16/32 MiB scoped default); v7x: 64 MiB per TC.
    Tiles are sized against ~70% of physical; the scoped limit is raised so the
    enlarged tiles compile on v5e/v6e. Falls back to v7x-sized numbers if the
    hardware query is unavailable (e.g. CPU interpret mode).
    """
    try:
        cap = int(pltpu.get_tpu_info().vmem_capacity_bytes)
    except Exception:
        cap = 64 * 1024 * 1024
    budget = min(int(cap * 0.70), 96 * 1024 * 1024)
    limit = min(int(cap * 0.90), 112 * 1024 * 1024)
    return budget, limit


def _pick_k_tile(in_dim: int, max_tk: int):
    """Pick the K tile. Returns (tk, ragged_k).

    Preference order:
      * full K in one block when it fits,
      * the largest 256-aligned divisor of in_dim (full MXU occupancy on the
        v6e/v7x 256x256 arrays), then a 128-aligned divisor (fine on v5e),
      * otherwise keep a large 256-aligned tile and mask the ragged K tail
        in-kernel (never collapse to tiny tk for awkward hidden sizes).
    """
    if in_dim <= max_tk:
        return in_dim, False
    for step in (256, 128):
        cand = (max_tk // step) * step
        found = 0
        while cand >= step:
            if in_dim % cand == 0:
                found = cand
                break
            cand -= step
        if found >= max(step, max_tk // 4):
            return found, False
    return max(256, (max_tk // 256) * 256), True


def _make_linear_kernel(*, has_bias, use_acc, ragged_k, in_dim, tk):
    def kernel(*refs):
        if has_bias:
            x_ref, w_ref, b_ref = refs[0], refs[1], refs[2]
            rest = refs[3:]
        else:
            x_ref, w_ref = refs[0], refs[1]
            b_ref = None
            rest = refs[2:]
        if use_acc:
            o_ref, acc_ref = rest
        else:
            (o_ref,) = rest
            acc_ref = o_ref  # f32 output: accumulate straight into the output block

        k = pl.program_id(2)

        x = x_ref[...]
        w = w_ref[...]
        if ragged_k:
            # Zero the out-of-bounds tail of the (last, ragged) K tile on BOTH
            # operands so stale-VMEM garbage (possibly NaN) never reaches the MXU.
            valid = in_dim - k * tk
            col = lax.broadcasted_iota(jnp.int32, x.shape, 1)
            row = lax.broadcasted_iota(jnp.int32, w.shape, 0)
            x = jnp.where(col < valid, x, jnp.zeros_like(x))
            w = jnp.where(row < valid, w, jnp.zeros_like(w))

        p = jnp.dot(x, w, preferred_element_type=jnp.float32)

        @pl.when(k == 0)
        def _():
            # First K step: write dot (+ bias) directly — no zero-fill pass,
            # no separate bias pass at the end.
            first = p
            if has_bias:
                first = first + b_ref[...].astype(jnp.float32)
            acc_ref[...] = first.astype(acc_ref.dtype)

        @pl.when(k > 0)
        def _():
            acc_ref[...] += p.astype(acc_ref.dtype)

        if use_acc:
            @pl.when(k == pl.num_programs(2) - 1)
            def _():
                o_ref[...] = acc_ref[...].astype(o_ref.dtype)

    return kernel


def linear_pallas(x, weight, bias=None, *, compute_dtype=None):
    """y = einsum('io, ...i -> ...o', weight, x) + bias."""
    in_dim, out_dim = weight.shape
    lead_shape = x.shape[:-1]
    out_dtype = x.dtype
    x2d = x.reshape(-1, in_dim)
    M = x2d.shape[0]

    # Optional reduced-precision MXU path (f32 accumulation is kept by
    # preferred_element_type=f32). Off by default for bit-accuracy.
    if compute_dtype is not None:
        x2d = x2d.astype(compute_dtype)
        weight = weight.astype(compute_dtype)

    has_bias = bias is not None
    use_acc = jnp.dtype(out_dtype) != jnp.dtype(jnp.float32)

    budget, vmem_limit = _vmem_budget_and_limit()
    xb = x2d.dtype.itemsize
    wb = weight.dtype.itemsize
    ob = jnp.dtype(out_dtype).itemsize

    # ---- Tile selection (regime-aware, VMEM-budgeted, no wrapper padding) ----
    if M <= 512:
        # Decode / per-token: one M block, maximize tn*tk so the weight streams
        # from HBM exactly once.
        tm = M
        tn = min(2048, out_dim)
    else:
        # Prefill / training: larger tm cuts weight re-fetch (prop. cdiv(M,tm)).
        tm = 512
        tn = min(1024, out_dim)

    # Guarantee >=2 tiles on a 'parallel' axis so both v7x TensorCores get work
    # (one extra grid step; negligible on single-TC v5e/v6e).
    if M <= tm and out_dim <= tn and out_dim >= 512:
        tn = _round_up(_cdiv(out_dim, 2), 128)

    # K tile from the remaining per-step budget (inputs/outputs are
    # double-buffered by the pipeline; the f32 accumulator is single-buffered).
    fixed = 2 * tm * tn * ob + (tm * tn * 4 if use_acc else 0)
    per_k = 2 * (tm * xb + tn * wb)
    max_tk = max(256, min(2048, (budget - fixed) // per_k))
    max_tk = max(256, (max_tk // 256) * 256)
    tk, ragged_k = _pick_k_tile(in_dim, max_tk)

    grid = (_cdiv(M, tm), _cdiv(out_dim, tn), _cdiv(in_dim, tk))
    m_tiles, n_tiles, _ = grid

    in_specs = [
        pl.BlockSpec((tm, tk), lambda i, j, k: (i, k)),   # x tile
        pl.BlockSpec((tk, tn), lambda i, j, k: (k, j)),   # weight tile (index is
                                                          # constant over i, so it
                                                          # stays VMEM-resident when
                                                          # K and N are single blocks)
    ]
    operands = [x2d, weight]
    if has_bias:
        in_specs.append(pl.BlockSpec((1, tn), lambda i, j, k: (0, j)))
        operands.append(bias.reshape(1, out_dim))

    out_spec = pl.BlockSpec((tm, tn), lambda i, j, k: (i, j))
    scratch_shapes = [pltpu.VMEM((tm, tn), jnp.float32)] if use_acc else []

    kernel = _make_linear_kernel(
        has_bias=has_bias, use_acc=use_acc, ragged_k=ragged_k,
        in_dim=in_dim, tk=tk)

    bytes_accessed = (
        weight.size * wb * m_tiles            # weight re-fetched once per M tile
        + x2d.size * xb * n_tiles             # x re-fetched once per N tile
        + M * out_dim * ob                    # output written once
        + (out_dim * bias.dtype.itemsize * m_tiles * n_tiles if has_bias else 0)
    )
    cost = pl.CostEstimate(
        flops=2 * M * in_dim * out_dim,
        transcendentals=0,
        bytes_accessed=int(bytes_accessed),
    )

    out = pl.pallas_call(
        kernel,
        out_shape=jax.ShapeDtypeStruct((M, out_dim), out_dtype),
        grid_spec=pltpu.PrefetchScalarGridSpec(
            num_scalar_prefetch=0,
            grid=grid,
            in_specs=in_specs,
            out_specs=out_spec,
            scratch_shapes=scratch_shapes,
        ),
        compiler_params=pltpu.CompilerParams(
            # M and N shard across megacore TCs; K (reduction) stays serial.
            dimension_semantics=("parallel", "parallel", "arbitrary"),
            vmem_limit_bytes=vmem_limit,
        ),
        cost_estimate=cost,
    )(*operands)

    return out.reshape(*lead_shape, out_dim)


if __name__ == "__main__":
    key = jax.random.PRNGKey(0)
    k_w, k_x = jax.random.split(key)

    in_dim, out_dim = 32, 128
    batch, seq = 2, 8

    # Deterministic parameter init, matching the module's __init__:
    #   weight ~ randn(in_dim, out_dim) * 0.02 ; bias = zeros(out_dim)
    weight = jax.random.normal(k_w, (in_dim, out_dim), dtype=jnp.float32) * 0.02
    bias = jnp.zeros((out_dim,), dtype=jnp.float32)

    x = jax.random.normal(k_x, (batch, seq, in_dim), dtype=jnp.float32)

    y = linear_pallas(x, weight, bias)
    y = jax.block_until_ready(y)

    # Reference check (plain JAX einsum, same semantics as torch.einsum).
    y_ref = jnp.einsum("io,...i->...o", weight, x) + bias
    assert y.shape == (batch, seq, out_dim)
    assert jnp.allclose(y, y_ref, atol=1e-5, rtol=1e-5)

    print("KERNEL_OK")
</pallas_src>

<mosaic_0001>
module attributes {stable_mosaic.version = 11 : i64} {
  func.func @kernel(%arg0: i32, %arg1: i32, %arg2: i32, %arg3: memref<16x32xf32, #tpu.memory_space<vmem>>, %arg4: memref<32x128xf32, #tpu.memory_space<vmem>>, %arg5: memref<1x128xf32, #tpu.memory_space<vmem>>, %arg6: memref<16x128xf32, #tpu.memory_space<vmem>>) attributes {dimension_semantics = [#tpu.dimension_semantics<parallel>, #tpu.dimension_semantics<parallel>, #tpu.dimension_semantics<arbitrary>], iteration_bounds = array<i64: 1, 1, 1>, scalar_prefetch = 0 : i64, scratch_operands = 0 : i64, tpu.core_type = #tpu.core_type<tc>, window_params = [{transform_indices = @transform_0, window_bounds = array<i64: 16, 32>}, {transform_indices = @transform_1, window_bounds = array<i64: 32, 128>}, {transform_indices = @transform_2, window_bounds = array<i64: 1, 128>}, {transform_indices = @transform_3, window_bounds = array<i64: 16, 128>}]} {
    %c0 = arith.constant 0 : index
    %c0_0 = arith.constant 0 : index
    %0 = vector.load %arg3[%c0, %c0_0] : memref<16x32xf32, #tpu.memory_space<vmem>>, vector<16x32xf32>
    %c0_1 = arith.constant 0 : index
    %c0_2 = arith.constant 0 : index
    %1 = vector.load %arg4[%c0_1, %c0_2] : memref<32x128xf32, #tpu.memory_space<vmem>>, vector<32x128xf32>
    %cst = arith.constant dense<0.000000e+00> : vector<16x128xf32>
    %2 = tpu.matmul %0, %1, %cst {dimension_numbers = #tpu.dot_dimension_numbers<[1], [0], [0], [1], [0, 0, 1, 1], [], []>} : vector<16x32xf32>, vector<32x128xf32>, vector<16x128xf32> -> vector<16x128xf32>
    %c0_i32 = arith.constant 0 : i32
    %3 = arith.cmpi eq, %arg2, %c0_i32 : i32
    %4 = arith.extui %3 : i1 to i32
    %c0_i32_3 = arith.constant 0 : i32
    %5 = arith.cmpi ne, %4, %c0_i32_3 : i32
    scf.if %5 {
      %c0_6 = arith.constant 0 : index
      %c0_7 = arith.constant 0 : index
      %9 = vector.load %arg5[%c0_6, %c0_7] : memref<1x128xf32, #tpu.memory_space<vmem>>, vector<1x128xf32>
      %10 = vector.broadcast %9 : vector<1x128xf32> to vector<16x128xf32>
      %11 = arith.addf %2, %10 : vector<16x128xf32>
      %c0_8 = arith.constant 0 : index
      %c0_9 = arith.constant 0 : index
      %12 = vector.load %arg6[%c0_8, %c0_9] : memref<16x128xf32, #tpu.memory_space<vmem>>, vector<16x128xf32>
      tpu.vector_store %arg6[%c0_8, %c0_9], %11 {strides = array<i32>} : memref<16x128xf32, #tpu.memory_space<vmem>>, vector<16x128xf32>,
    } else {
    }
    %c0_i32_4 = arith.constant 0 : i32
    %6 = arith.cmpi sgt, %arg2, %c0_i32_4 : i32
    %7 = arith.extui %6 : i1 to i32
    %c0_i32_5 = arith.constant 0 : i32
    %8 = arith.cmpi ne, %7, %c0_i32_5 : i32
    scf.if %8 {
      %c0_6 = arith.constant 0 : index
      %c0_7 = arith.constant 0 : index
      %9 = vector.load %arg6[%c0_6, %c0_7] : memref<16x128xf32, #tpu.memory_space<vmem>>, vector<16x128xf32>
      %10 = arith.addf %9, %2 : vector<16x128xf32>
      %c0_8 = arith.constant 0 : index
      %c0_9 = arith.constant 0 : index
      %11 = vector.load %arg6[%c0_8, %c0_9] : memref<16x128xf32, #tpu.memory_space<vmem>>, vector<16x128xf32>
      tpu.vector_store %arg6[%c0_8, %c0_9], %10 {strides = array<i32>} : memref<16x128xf32, #tpu.memory_space<vmem>>, vector<16x128xf32>,
    } else {
    }
    return
  }
  func.func @transform_0(%arg0: i32, %arg1: i32, %arg2: i32) -> (i32, i32) {
    %c0_i32 = arith.constant 0 : i32
    return %arg0, %arg2 : i32, i32
  }
  func.func @transform_1(%arg0: i32, %arg1: i32, %arg2: i32) -> (i32, i32) {
    %c0_i32 = arith.constant 0 : i32
    return %arg2, %arg1 : i32, i32
  }
  func.func @transform_2(%arg0: i32, %arg1: i32, %arg2: i32) -> (i32, i32) {
    %c0_i32 = arith.constant 0 : i32
    %c0_i32_0 = arith.constant 0 : i32
    return %c0_i32, %arg1 : i32, i32
  }
  func.func @transform_3(%arg0: i32, %arg1: i32, %arg2: i32) -> (i32, i32) {
    %c0_i32 = arith.constant 0 : i32
    return %arg0, %arg1 : i32, i32
  }
}

</mosaic_0001>

<bundles_post_ra>
// kernel: tpu_custom_call.1
= control target key start
LH: loop header
LB: loop body
LE: loop exit
PB: predicated region body
PF: predicated region fallthrough
CT: control target
= control target key end

     0   :  { %8 = vsyncpa [#allocation3], 0  ;;  %s352_s0 = inlined_call_operand.hbm [shape: f32[16,32], index: 0, kind: input, shape index: {}]   ;;  %s353_s1 = inlined_call_operand.hbm [shape: f32[32,128], index: 1, kind: input, shape index: {}]   ;;  %s354_s2 = inlined_call_operand.vmem [shape: f32[1,128], index: 2, kind: input, shape index: {}]   ;;  %s355_s3 = inlined_call_operand.hbm [shape: f32[16,128], index: 3, kind: output, shape index: {}]  }
   0x1   :  { %9 = vsyncpa [#allocation6], 0 }
   0x2   :  { %10 = vsyncpa [#allocation4], 0  ;;  %s279_s12 = smov [#allocation2]   ;;  %s207_s16 = scalar_lea.hbm %s352_s0, 256 }
   0x3   :  { %s16_s13 = sshll.u32 %s279_s12, 4  ;;  %p208_p0 = scmp.ne.s32.totalorder %s352_s0, %s207_s16  ;;  %s17_s13 = int_to_ptr.vmem [resolvable:$true] %s16_s13 }
   0x4   :  { %p211_p1 = scmp.lt.u32.totalorder %s207_s16, %s352_s0 }
   0x6   :  { %p213_p2 = pnand %p211_p1, %p208_p0 }
   0x8   :  { %216 = shalt.err (!%p213_p2)
}
   0x9   :  { %s217_s21 = scalar_lea.vmem %s17_s13, 256  ;;  %p222_p4 = scmp.lt.s32.totalorder %s17_s13, %s17_s13 }
   0xa   :  { %p218_p3 = scmp.ne.s32.totalorder %s17_s13, %s217_s21  ;;  %p223_p5 = scmp.lt.s32.totalorder %s217_s21, %s217_s21 }
   0xc   :  { %p224_p6 = por %p223_p5, %p222_p4 }
   0xe   :  { %p225_p7 = pnand %p224_p6, %p218_p3 }
  0x10   :  { %228 = shalt.err (!%p225_p7)
}
  0x11   :  { %s280_s22 = smov 128   ;;  %s281_s23 = smov 8  }
  0x12   :  { %22 = dma.hbm_to_vmem [thread:$0]  %s352_s0, 256, %s17_s13, [#allocation3], %s280_s22, %s280_s22, %s281_s23  }
  0x13   :  { %s282_s26 = smov [#allocation5]   ;;  %s229_s30 = scalar_lea.hbm %s353_s1, 512 }
  0x14   :  { %s28_s27 = sshll.u32 %s282_s26, 4  ;;  %p230_p8 = scmp.ne.s32.totalorder %s353_s1, %s229_s30  ;;  %s29_s27 = int_to_ptr.vmem [resolvable:$true] %s28_s27 }
  0x15   :  { %p233_p9 = scmp.lt.u32.totalorder %s229_s30, %s353_s1 }
  0x17   :  { %p235_p10 = pnand %p233_p9, %p230_p8 }
  0x19   :  { %238 = shalt.err (!%p235_p10)
}
  0x1a   :  { %s239_s8 = scalar_lea.vmem %s29_s27, 512  ;;  %p244_p12 = scmp.lt.s32.totalorder %s29_s27, %s29_s27 }
  0x1b   :  { %p240_p11 = scmp.ne.s32.totalorder %s29_s27, %s239_s8  ;;  %p245_p13 = scmp.lt.s32.totalorder %s239_s8, %s239_s8 }
  0x1d   :  { %p246_p0 = por %p245_p13, %p244_p12 }
  0x1f   :  { %p247_p1 = pnand %p246_p0, %p240_p11 }
  0x21   :  { %250 = shalt.err (!%p247_p1)
}
  0x22   :  { %34 = dma.hbm_to_vmem [thread:$0]  %s353_s1, 512, %s29_s27, [#allocation6], %s280_s22, %s280_s22, %s281_s23  }
  0x23   :  { %273 = dma.done.wait [#allocation3], 256  }
  0x24   :  { %274 = vsyncadd [#allocation3], 4294967040 }
  0x25   :  { %275 = dma.done.wait [#allocation6], 512  }
  0x26   :  { %276 = vsyncadd [#allocation6], 4294966784  ;;  %vm49_vm0 = vcmask 261120   ;;  %v45_v0 = vld [vmem:[#allocation5] sm:$0xff]  ;;  %v46_v1 = vld [vmem:[#allocation5 + $0x8] sm:$0xff]  ;;  %s283_s11 = smov [#allocation7]  }
  0x27   :  { %v47_v2 = vld [vmem:[#allocation5 + $0x10] sm:$0xff]  ;;  %v194_v3 = vpack.c.bf16 %v46_v1, %v45_v0  ;;  %v48_v4 = vld [vmem:[#allocation5 + $0x18] sm:$0xff]  ;;  %s161_s12 = sshll.u32 %s283_s11, 4  ;;  %s162_s12 = int_to_ptr.vmem [resolvable:$true] %s161_s12 }
  0x28   :  { %v43_v5 = vld [vmem:[#allocation2] sm:$0xff]  ;;  %v198_v6 = vpack.c.bf16 %v48_v4, %v47_v2  ;;  %v44_v7 = vld [vmem:[#allocation2 + $0x8] sm:$0xff]  ;;  %s251_s13 = scalar_lea.vmem %s162_s12, 256  ;;  %p256_p3 = scmp.lt.s32.totalorder %s162_s12, %s162_s12 }
  0x29   :  { %191 = vmatprep.mubr.msk.f32.mxu0 %vm49_vm0, %v43_v5  ;;  %195 = vmatprep.subr.bf16.mxu0 %v194_v3  ;;  %v176_v8 = vld [vmem:[%s354_s2] ss:$0 sm:$0xff]  ;;  %p252_p2 = scmp.ne.s32.totalorder %s162_s12, %s251_s13  ;;  %p257_p4 = scmp.lt.s32.totalorder %s251_s13, %s251_s13 }
  0x2a   :  { %197 = vmatpush3.bf16.msra.mxu0 %v194_v3 }
  0x2b   :  { %199 = vmatprep.subr.bf16.mxu0 %v198_v6  ;;  %p258_p5 = por %p257_p4, %p256_p3 }
  0x2d   :  { %p259_p6 = pnand %p258_p5, %p252_p2 }
  0x2e   :  { %201 = vmatpush3.bf16.msra.mxu0 %v198_v6 }
  0x31   :  { %192 = vmatmul.mubr.msk.f32.vlgmr.msra.gmra.mrb[0].mxu0 %vm49_vm0, %v44_v7 }
 0x104   :  { %v193_v9 = vpop.f32.mrb[0].mxu0 }
 0x105   :  { %v143_v10 = vadd.f32 %v193_v9, %v176_v8  ;;  %v122_v11 = vpop.f32.mrb[1].mxu0 }
 0x106   :  { %v142_v12 = vadd.f32 %v176_v8, %v122_v11 }
 0x107   :  { %145 = vst [vmem:[#allocation7 + $0x8] sm:$0xff] %v143_v10 }
 0x108   :  { %144 = vst [vmem:[#allocation7] sm:$0xff] %v142_v12 }
 0x109   :  { %262 = shalt.err (!%p259_p6)
}
 0x10a   :  { %s263_s2 = scalar_lea.hbm %s355_s3, 256 }
 0x10b   :  { %p264_p7 = scmp.ne.s32.totalorder %s355_s3, %s263_s2  ;;  %p267_p8 = scmp.lt.u32.totalorder %s263_s2, %s355_s3 }
 0x10d   :  { %p269_p9 = pnand %p267_p8, %p264_p7 }
 0x10f   :  { %272 = shalt.err (!%p269_p9)
}
 0x110   :  { %167 = dma.vmem_to_hbm [thread:$0]  %s162_s12, 256, %s355_s3, [#allocation4], %s280_s22, %s280_s22, %s281_s23  }
 0x111   :  { %277 = dma.done.wait [#allocation4], 256  }
 0x112   :  { %278 = vsyncadd [#allocation4], 4294967040 }
 0x113   :  { %171 = vsyncpa [#allocation3], 1 }
 0x114   :  { %172 = vsyncpa [#allocation6], 1 }
 0x115   :  { %173 = vsyncpa [#allocation4], 1 }

</bundles_post_ra>
